<compile_context>
chip_gen: v6e
topology: v6e:2x2x1
jax: 0.10.0
libtpu: 0.0.40
codegen_flags: <defaults>
</compile_context>

<pallas_src>
import jax
import jax.numpy as jnp
from jax import lax
from jax.experimental import pallas as pl
from jax.experimental.pallas import tpu as pltpu


def _round_up(x, m):
    return ((x + m - 1) // m) * m


def fc_kernel(x_ref, w_ref, b_ref, o_ref, acc_ref):
    # x_ref: (tm, tk), w_ref: (tn, tk)  [PyTorch (nout, nfeat) layout, K-tiled]
    # b_ref: (1, tn),  o_ref: (tm, tn), acc_ref: (tm, tn) f32 scratch.
    k = pl.program_id(2)

    @pl.when(k == 0)
    def _():
        acc_ref[...] = jnp.zeros_like(acc_ref)

    # Contract x axis 1 with w axis 1 (== x @ w.T) -> (tm, tn), f32 MXU accumulation.
    acc_ref[...] += lax.dot_general(
        x_ref[...], w_ref[...],
        dimension_numbers=(((1,), (1,)), ((), ())),
        preferred_element_type=jnp.float32,
    )

    @pl.when(k == pl.num_programs(2) - 1)
    def _():
        y = acc_ref[...] + b_ref[...]
        # LeakyReLU, PyTorch default negative_slope = 0.01.
        o_ref[...] = jnp.where(y >= 0, y, 0.01 * y).astype(o_ref.dtype)


def fc_forward(x, weight, bias, *, tm=256, tn=256, tk=512, compute_dtype=None):
    """FC forward: LeakyReLU(x @ weight.T + bias); dropout is identity (eval mode).

    x: (N, nfeat); weight: (nout, nfeat) [PyTorch layout, NOT transposed]; bias: (nout,).
    compute_dtype: optionally cast x/weight (e.g. jnp.bfloat16) for MXU/HBM wins;
    accumulation stays f32 either way.
    """
    N, nfeat = x.shape
    nout, nfeat_w = weight.shape
    assert nfeat == nfeat_w, "weight must be (nout, nfeat)"
    out_dtype = x.dtype

    if compute_dtype is not None:
        x = x.astype(compute_dtype)
        weight = weight.astype(compute_dtype)

    # Clamp tiles for small problems while keeping (8, 128) alignment.
    tm = min(tm, _round_up(N, 8))
    tn = min(tn, _round_up(nout, 128))
    tk = min(tk, _round_up(nfeat, 128))

    Np = _round_up(N, tm)
    Kp = _round_up(nfeat, tk)
    NOp = _round_up(nout, tn)

    # Zero-pad (wrapper glue): K-padding is exact for the matmul; padded rows and
    # output columns are sliced off below. For real models the weight/bias padding
    # would be done once outside the hot path.
    if (Np, Kp) != (N, nfeat):
        x = jnp.pad(x, ((0, Np - N), (0, Kp - nfeat)))
    if (NOp, Kp) != (nout, nfeat):
        weight = jnp.pad(weight, ((0, NOp - nout), (0, Kp - nfeat)))
    b_row = bias.astype(jnp.float32).reshape(1, nout)
    if NOp != nout:
        b_row = jnp.pad(b_row, ((0, 0), (0, NOp - nout)))

    grid = (Np // tm, NOp // tn, Kp // tk)

    # Scheduling hints.
    flops = 2 * Np * Kp * NOp
    bytes_accessed = (x.size * x.dtype.itemsize
                      + weight.size * weight.dtype.itemsize
                      + b_row.size * 4
                      + Np * NOp * jnp.dtype(out_dtype).itemsize)

    # Explicit VMEM budget: double-buffered in/out tiles + f32 accumulator, with
    # headroom; capped at 64 MiB so it is valid on v7x as well.
    tile_bytes = (2 * (tm * tk + tn * tk) * x.dtype.itemsize
                  + 2 * tn * 4
                  + 2 * tm * tn * jnp.dtype(out_dtype).itemsize
                  + tm * tn * 4)
    vmem_limit = int(min(max(4 * tile_bytes, 16 * 1024 * 1024), 64 * 1024 * 1024))

    out = pl.pallas_call(
        fc_kernel,
        out_shape=jax.ShapeDtypeStruct((Np, NOp), out_dtype),
        grid_spec=pltpu.PrefetchScalarGridSpec(
            num_scalar_prefetch=0,
            grid=grid,
            in_specs=[
                pl.BlockSpec((tm, tk), lambda i, j, k: (i, k)),   # x tile
                pl.BlockSpec((tn, tk), lambda i, j, k: (j, k)),   # weight tile (nout, nfeat)
                pl.BlockSpec((1, tn), lambda i, j, k: (0, j)),    # bias row tile
            ],
            out_specs=pl.BlockSpec((tm, tn), lambda i, j, k: (i, j)),
            scratch_shapes=[pltpu.VMEM((tm, tn), jnp.float32)],
        ),
        compiler_params=pltpu.CompilerParams(
            dimension_semantics=("parallel", "parallel", "arbitrary"),
            vmem_limit_bytes=vmem_limit,
        ),
        cost_estimate=pl.CostEstimate(
            flops=int(flops), transcendentals=0, bytes_accessed=int(bytes_accessed)),
    )(x, weight, b_row)

    if (Np, NOp) != (N, nout):
        out = out[:N, :nout]
    return out


def fc_reference(x, weight, bias):
    y = x.astype(jnp.float32) @ weight.astype(jnp.float32).T + bias.astype(jnp.float32)
    return jnp.where(y >= 0, y, 0.01 * y)


if __name__ == "__main__":
    key = jax.random.PRNGKey(0)

    # --- Test 1: small shapes matching FC(nfeat=32, nout=32), batch=16, f32 exact.
    N, nfeat, nout = 16, 32, 32
    kx, kw, kb = jax.random.split(key, 3)
    bound = 1.0 / (nfeat ** 0.5)
    x = jax.random.normal(kx, (N, nfeat), dtype=jnp.float32)
    weight = jax.random.uniform(kw, (nout, nfeat), minval=-bound, maxval=bound,
                                dtype=jnp.float32)
    bias = jax.random.uniform(kb, (nout,), minval=-bound, maxval=bound,
                              dtype=jnp.float32)

    out = jax.block_until_ready(fc_forward(x, weight, bias))
    ref = fc_reference(x, weight, bias)
    assert out.shape == (N, nout)
    assert jnp.allclose(out, ref, atol=1e-5, rtol=1e-5), "f32 small mismatch"

    # --- Test 2: non-multiple shapes exercise padding + 3-axis tiling, f32.
    N2, nfeat2, nout2 = 200, 384, 192
    k2x, k2w, k2b = jax.random.split(jax.random.PRNGKey(1), 3)
    bound2 = 1.0 / (nfeat2 ** 0.5)
    x2 = jax.random.normal(k2x, (N2, nfeat2), dtype=jnp.float32)
    w2 = jax.random.uniform(k2w, (nout2, nfeat2), minval=-bound2, maxval=bound2,
                            dtype=jnp.float32)
    b2 = jax.random.uniform(k2b, (nout2,), minval=-bound2, maxval=bound2,
                            dtype=jnp.float32)
    out2 = jax.block_until_ready(fc_forward(x2, w2, b2, tm=256, tn=128, tk=128))
    ref2 = fc_reference(x2, w2, b2)
    assert out2.shape == (N2, nout2)
    assert jnp.allclose(out2, ref2, atol=1e-4, rtol=1e-4), "f32 padded mismatch"

    # --- Test 3: bf16 compute path (f32 accumulation), loose tolerance.
    out_bf = jax.block_until_ready(
        fc_forward(x, weight, bias, compute_dtype=jnp.bfloat16))
    assert out_bf.shape == (N, nout)
    assert jnp.allclose(out_bf.astype(jnp.float32), ref, atol=5e-2, rtol=5e-2), \
        "bf16 mismatch"

    print("KERNEL_OK")
</pallas_src>

<mosaic_0001>
module attributes {stable_mosaic.version = 11 : i64} {
  func.func @fc_kernel(%arg0: i32, %arg1: i32, %arg2: i32, %arg3: memref<16x128xf32, #tpu.memory_space<vmem>>, %arg4: memref<128x128xf32, #tpu.memory_space<vmem>>, %arg5: memref<1x128xf32, #tpu.memory_space<vmem>>, %arg6: memref<16x128xf32, #tpu.memory_space<vmem>>, %arg7: memref<16x128xf32, #tpu.memory_space<vmem>>) attributes {dimension_semantics = [#tpu.dimension_semantics<parallel>, #tpu.dimension_semantics<parallel>, #tpu.dimension_semantics<arbitrary>], iteration_bounds = array<i64: 1, 1, 1>, scalar_prefetch = 0 : i64, scratch_operands = 1 : i64, tpu.core_type = #tpu.core_type<tc>, window_params = [{transform_indices = @transform_0, window_bounds = array<i64: 16, 128>}, {transform_indices = @transform_1, window_bounds = array<i64: 128, 128>}, {transform_indices = @transform_2, window_bounds = array<i64: 1, 128>}, {transform_indices = @transform_3, window_bounds = array<i64: 16, 128>}]} {
    %c0_i32 = arith.constant 0 : i32
    %0 = arith.cmpi eq, %arg2, %c0_i32 : i32
    %1 = arith.extui %0 : i1 to i32
    %c0_i32_0 = arith.constant 0 : i32
    %2 = arith.cmpi ne, %1, %c0_i32_0 : i32
    scf.if %2 {
      %cst_10 = arith.constant 0.000000e+00 : f32
      %12 = vector.broadcast %cst_10 : f32 to vector<16x128xf32>
      %c0_11 = arith.constant 0 : index
      %c0_12 = arith.constant 0 : index
      %13 = vector.load %arg7[%c0_11, %c0_12] : memref<16x128xf32, #tpu.memory_space<vmem>>, vector<16x128xf32>
      tpu.vector_store %arg7[%c0_11, %c0_12], %12 {strides = array<i32>} : memref<16x128xf32, #tpu.memory_space<vmem>>, vector<16x128xf32>,
    } else {
    }
    %c0 = arith.constant 0 : index
    %c0_1 = arith.constant 0 : index
    %3 = vector.load %arg7[%c0, %c0_1] : memref<16x128xf32, #tpu.memory_space<vmem>>, vector<16x128xf32>
    %c0_2 = arith.constant 0 : index
    %c0_3 = arith.constant 0 : index
    %4 = vector.load %arg3[%c0_2, %c0_3] : memref<16x128xf32, #tpu.memory_space<vmem>>, vector<16x128xf32>
    %c0_4 = arith.constant 0 : index
    %c0_5 = arith.constant 0 : index
    %5 = vector.load %arg4[%c0_4, %c0_5] : memref<128x128xf32, #tpu.memory_space<vmem>>, vector<128x128xf32>
    %cst = arith.constant dense<0.000000e+00> : vector<16x128xf32>
    %6 = tpu.matmul %4, %5, %cst {dimension_numbers = #tpu.dot_dimension_numbers<[1], [1], [0], [0], [0, 0, 1, 0], [], []>} : vector<16x128xf32>, vector<128x128xf32>, vector<16x128xf32> -> vector<16x128xf32>
    %7 = arith.addf %3, %6 : vector<16x128xf32>
    %c0_6 = arith.constant 0 : index
    %c0_7 = arith.constant 0 : index
    %8 = vector.load %arg7[%c0_6, %c0_7] : memref<16x128xf32, #tpu.memory_space<vmem>>, vector<16x128xf32>
    tpu.vector_store %arg7[%c0_6, %c0_7], %7 {strides = array<i32>} : memref<16x128xf32, #tpu.memory_space<vmem>>, vector<16x128xf32>,
    %c0_i32_8 = arith.constant 0 : i32
    %9 = arith.cmpi eq, %arg2, %c0_i32_8 : i32
    %10 = arith.extui %9 : i1 to i32
    %c0_i32_9 = arith.constant 0 : i32
    %11 = arith.cmpi ne, %10, %c0_i32_9 : i32
    scf.if %11 {
      %c0_10 = arith.constant 0 : index
      %c0_11 = arith.constant 0 : index
      %12 = vector.load %arg7[%c0_10, %c0_11] : memref<16x128xf32, #tpu.memory_space<vmem>>, vector<16x128xf32>
      %c0_12 = arith.constant 0 : index
      %c0_13 = arith.constant 0 : index
      %13 = vector.load %arg5[%c0_12, %c0_13] : memref<1x128xf32, #tpu.memory_space<vmem>>, vector<1x128xf32>
      %14 = vector.broadcast %13 : vector<1x128xf32> to vector<16x128xf32>
      %15 = arith.addf %12, %14 : vector<16x128xf32>
      %cst_14 = arith.constant 0.000000e+00 : f32
      %16 = vector.broadcast %cst_14 : f32 to vector<16x128xf32>
      %17 = arith.cmpf oge, %15, %16 : vector<16x128xf32>
      %cst_15 = arith.constant 0.00999999977 : f32
      %18 = vector.broadcast %cst_15 : f32 to vector<16x128xf32>
      %19 = arith.mulf %18, %15 : vector<16x128xf32>
      %20 = arith.select %17, %15, %19 : vector<16x128xi1>, vector<16x128xf32>
      %c0_16 = arith.constant 0 : index
      %c0_17 = arith.constant 0 : index
      %21 = vector.load %arg6[%c0_16, %c0_17] : memref<16x128xf32, #tpu.memory_space<vmem>>, vector<16x128xf32>
      tpu.vector_store %arg6[%c0_16, %c0_17], %20 {strides = array<i32>} : memref<16x128xf32, #tpu.memory_space<vmem>>, vector<16x128xf32>,
    } else {
    }
    return
  }
  func.func @transform_0(%arg0: i32, %arg1: i32, %arg2: i32) -> (i32, i32) {
    %c0_i32 = arith.constant 0 : i32
    return %arg0, %arg2 : i32, i32
  }
  func.func @transform_1(%arg0: i32, %arg1: i32, %arg2: i32) -> (i32, i32) {
    %c0_i32 = arith.constant 0 : i32
    return %arg1, %arg2 : i32, i32
  }
  func.func @transform_2(%arg0: i32, %arg1: i32, %arg2: i32) -> (i32, i32) {
    %c0_i32 = arith.constant 0 : i32
    %c0_i32_0 = arith.constant 0 : i32
    return %c0_i32, %arg1 : i32, i32
  }
  func.func @transform_3(%arg0: i32, %arg1: i32, %arg2: i32) -> (i32, i32) {
    %c0_i32 = arith.constant 0 : i32
    return %arg0, %arg1 : i32, i32
  }
}

</mosaic_0001>

<bundles_post_ra>
// kernel: tpu_custom_call.1
= control target key start
LH: loop header
LB: loop body
LE: loop exit
PB: predicated region body
PF: predicated region fallthrough
CT: control target
= control target key end

     0   :  { %8 = vsyncpa [#allocation4], 0  ;;  %s359_s0 = inlined_call_operand.hbm [shape: f32[16,128], index: 0, kind: input, shape index: {}]   ;;  %s360_s1 = inlined_call_operand.hbm [shape: f32[128,128], index: 1, kind: input, shape index: {}]   ;;  %s361_s2 = inlined_call_operand.vmem [shape: f32[1,128], index: 2, kind: input, shape index: {}]   ;;  %s362_s3 = inlined_call_operand.hbm [shape: f32[16,128], index: 3, kind: output, shape index: {}]  }
   0x1   :  { %9 = vsyncpa [#allocation7], 0 }
   0x2   :  { %10 = vsyncpa [#allocation5], 0  ;;  %s313_s12 = smov [#allocation3]  }
   0x3   :  { %s16_s13 = sshll.u32 %s313_s12, 4  ;;  %s17_s13 = int_to_ptr.vmem [resolvable:$true] %s16_s13 }
   0x4   :  { %s255_s14 = scalar_lea.vmem %s17_s13, 256  ;;  %p260_p1 = scmp.lt.s32.totalorder %s17_s13, %s17_s13 }
   0x5   :  { %p256_p0 = scmp.ne.s32.totalorder %s17_s13, %s255_s14  ;;  %p261_p2 = scmp.lt.s32.totalorder %s255_s14, %s255_s14 }
   0x7   :  { %p262_p3 = por %p261_p2, %p260_p1 }
   0x9   :  { %p263_p4 = pnand %p262_p3, %p256_p0 }
   0xb   :  { %266 = shalt.err (!%p263_p4)
}
   0xc   :  { %s314_s15 = smov 128   ;;  %s315_s16 = smov 8  }
   0xd   :  { %22 = dma.hbm_to_vmem [thread:$0]  %s359_s0, 256, %s17_s13, [#allocation4], %s314_s15, %s314_s15, %s315_s16  }
   0xe   :  { %s316_s19 = smov [#allocation6]  }
   0xf   :  { %s28_s20 = sshll.u32 %s316_s19, 4  ;;  %s29_s20 = int_to_ptr.vmem [resolvable:$true] %s28_s20 }
  0x10   :  { %s275_s21 = scalar_lea.vmem %s29_s20, 2048  ;;  %p280_p6 = scmp.lt.s32.totalorder %s29_s20, %s29_s20 }
  0x11   :  { %p276_p5 = scmp.ne.s32.totalorder %s29_s20, %s275_s21  ;;  %p281_p7 = scmp.lt.s32.totalorder %s275_s21, %s275_s21 }
  0x13   :  { %p282_p8 = por %p281_p7, %p280_p6 }
  0x15   :  { %p283_p9 = pnand %p282_p8, %p276_p5 }
  0x17   :  { %286 = shalt.err (!%p283_p9)
}
  0x18   :  { %34 = dma.hbm_to_vmem [thread:$0]  %s360_s1, 2048, %s29_s20, [#allocation7], %s314_s15, %s314_s15, %s315_s16  }
  0x19   :  { %307 = dma.done.wait [#allocation4], 256  }
  0x1a   :  { %308 = vsyncadd [#allocation4], 4294967040 }
  0x1b   :  { %309 = dma.done.wait [#allocation7], 2048  }
  0x1c   :  { %310 = vsyncadd [#allocation7], 4294965248  ;;  %v68_v0 = vld [vmem:[#allocation6 + $0x78] sm:$0xff]  ;;  %v67_v1 = vld [vmem:[#allocation6 + $0x70] sm:$0xff]  ;;  %s317_s24 = smov [#allocation8]  }
  0x1d   :  { %207 = vmatprep.subr.mxu0 %v68_v0  ;;  %v66_v2 = vld [vmem:[#allocation6 + $0x68] sm:$0xff]  ;;  %v51_v3 = vld [vmem:[#allocation3] sm:$0xff]  ;;  %v65_v4 = vld [vmem:[#allocation6 + $0x60] sm:$0xff]  ;;  %s175_s25 = sshll.u32 %s317_s24, 4  ;;  %s176_s25 = int_to_ptr.vmem [resolvable:$true] %s175_s25 }
  0x1e   :  { %208 = vmatpush3.xpose.msra.mxu0 %v68_v0  ;;  %239 = vmatprep.mubr.f32.mxu0 %v51_v3  ;;  %v64_v5 = vld [vmem:[#allocation6 + $0x58] sm:$0xff]  ;;  %v63_v6 = vld [vmem:[#allocation6 + $0x50] sm:$0xff]  ;;  %v62_v7 = vld [vmem:[#allocation6 + $0x48] sm:$0xff]  ;;  %s287_s26 = scalar_lea.vmem %s176_s25, 256  ;;  %p292_p11 = scmp.lt.s32.totalorder %s176_s25, %s176_s25 }
  0x1f   :  { %209 = vmatprep.subr.mxu0 %v67_v1  ;;  %v61_v8 = vld [vmem:[#allocation6 + $0x40] sm:$0xff]  ;;  %v60_v9 = vld [vmem:[#allocation6 + $0x38] sm:$0xff]  ;;  %v59_v10 = vld [vmem:[#allocation6 + $0x30] sm:$0xff]  ;;  %p288_p10 = scmp.ne.s32.totalorder %s176_s25, %s287_s26  ;;  %p293_p12 = scmp.lt.s32.totalorder %s287_s26, %s287_s26 }
  0x20   :  { %v58_v11 = vld [vmem:[#allocation6 + $0x28] sm:$0xff]  ;;  %v57_v12 = vld [vmem:[#allocation6 + $0x20] sm:$0xff]  ;;  %v56_v13 = vld [vmem:[#allocation6 + $0x18] sm:$0xff] }
  0x21   :  { %v55_v14 = vld [vmem:[#allocation6 + $0x10] sm:$0xff]  ;;  %v54_v15 = vld [vmem:[#allocation6 + $0x8] sm:$0xff]  ;;  %v53_v16 = vld [vmem:[#allocation6] sm:$0xff]  ;;  %p294_p13 = por %p293_p12, %p292_p11 }
  0x22   :  { %210 = vmatpush3.xpose.msra.mxu0 %v67_v1  ;;  %v52_v17 = vld [vmem:[#allocation3 + $0x8] sm:$0xff]  ;;  %v188_v18 = vld [vmem:[%s361_s2] ss:$0 sm:$0xff] }
  0x23   :  { %211 = vmatprep.subr.mxu0 %v66_v2  ;;  %p295_p0 = pnand %p294_p13, %p288_p10 }
  0x26   :  { %212 = vmatpush3.xpose.msra.mxu0 %v66_v2 }
  0x27   :  { %213 = vmatprep.subr.mxu0 %v65_v4 }
  0x2a   :  { %214 = vmatpush3.xpose.msra.mxu0 %v65_v4 }
  0x2b   :  { %215 = vmatprep.subr.mxu0 %v64_v5 }
  0x2e   :  { %216 = vmatpush3.xpose.msra.mxu0 %v64_v5 }
  0x2f   :  { %217 = vmatprep.subr.mxu0 %v63_v6 }
  0x32   :  { %218 = vmatpush3.xpose.msra.mxu0 %v63_v6 }
  0x33   :  { %219 = vmatprep.subr.mxu0 %v62_v7 }
  0x36   :  { %220 = vmatpush3.xpose.msra.mxu0 %v62_v7 }
  0x37   :  { %221 = vmatprep.subr.mxu0 %v61_v8 }
  0x3a   :  { %222 = vmatpush3.xpose.msra.mxu0 %v61_v8 }
  0x3b   :  { %223 = vmatprep.subr.mxu0 %v60_v9 }
  0x3e   :  { %224 = vmatpush3.xpose.msra.mxu0 %v60_v9 }
  0x3f   :  { %225 = vmatprep.subr.mxu0 %v59_v10 }
  0x42   :  { %226 = vmatpush3.xpose.msra.mxu0 %v59_v10 }
  0x43   :  { %227 = vmatprep.subr.mxu0 %v58_v11 }
  0x46   :  { %228 = vmatpush3.xpose.msra.mxu0 %v58_v11 }
  0x47   :  { %229 = vmatprep.subr.mxu0 %v57_v12 }
  0x4a   :  { %230 = vmatpush3.xpose.msra.mxu0 %v57_v12 }
  0x4b   :  { %231 = vmatprep.subr.mxu0 %v56_v13 }
  0x4e   :  { %232 = vmatpush3.xpose.msra.mxu0 %v56_v13 }
  0x4f   :  { %233 = vmatprep.subr.mxu0 %v55_v14 }
  0x52   :  { %234 = vmatpush3.xpose.msra.mxu0 %v55_v14 }
  0x53   :  { %235 = vmatprep.subr.mxu0 %v54_v15 }
  0x56   :  { %236 = vmatpush3.xpose.msra.mxu0 %v54_v15 }
  0x57   :  { %237 = vmatprep.subr.mxu0 %v53_v16 }
  0x5a   :  { %238 = vmatpush3.xpose.msra.mxu0 %v53_v16 }
  0x5d   :  { %240 = vmatmul.mubr.f32.vlgmr.msra.gmra.mxu0 %v52_v17 }
 0x11d   :  { %v241_v19 = vpop.f32.mrf.mxu0 }
 0x11e   :  { %v161_v20 = vadd.f32 %v241_v19, %v188_v18 }
 0x11f   :  { %v135_v21 = vpop.f32.mrf.mxu0 }
 0x120   :  { %vm163_vm0 = vcmp.ge.f32.partialorder %v161_v20, 0.0  ;;  %v165_v22 = vmul.f32 0.01, %v161_v20  ;;  %v160_v23 = vadd.f32 %v188_v18, %v135_v21 }
 0x122   :  { %vm162_vm1 = vcmp.ge.f32.partialorder %v160_v23, 0.0  ;;  %v164_v24 = vmul.f32 0.01, %v160_v23  ;;  %v167_v25 = vsel %vm163_vm0, %v161_v20, %v165_v22 }
 0x123   :  { %169 = vst [vmem:[#allocation8 + $0x8] sm:$0xff] %v167_v25 }
 0x124   :  { %v166_v26 = vsel %vm162_vm1, %v160_v23, %v164_v24 }
 0x125   :  { %168 = vst [vmem:[#allocation8] sm:$0xff] %v166_v26 }
 0x126   :  { %298 = shalt.err (!%p295_p0)
}
 0x127   :  { %181 = dma.vmem_to_hbm [thread:$0]  %s176_s25, 256, %s362_s3, [#allocation5], %s314_s15, %s314_s15, %s315_s16  }
 0x128   :  { %311 = dma.done.wait [#allocation5], 256  }
 0x129   :  { %312 = vsyncadd [#allocation5], 4294967040 }
 0x12a   :  { %185 = vsyncpa [#allocation4], 1 }
 0x12b   :  { %186 = vsyncpa [#allocation7], 1 }
 0x12c   :  { %187 = vsyncpa [#allocation5], 1 }

</bundles_post_ra>
